<compile_context>
chip_gen: v7x
topology: tpu7x:2x2x1
jax: 0.10.0
libtpu: 0.0.40
codegen_flags: <defaults>
</compile_context>

<pallas_src>
import jax
import jax.numpy as jnp
from jax.experimental import pallas as pl
from jax.experimental.pallas import tpu as pltpu

EPS = 1e-5
LANE_PAD = 128  # pad classifier output lanes to a full vreg row


# ---------------------------------------------------------------------------
# Kernel (single step, whole arrays resident in VMEM)
# ---------------------------------------------------------------------------
def _make_kernel(n_batch, hw):
    inv_hw = 1.0 / float(hw)

    def kernel(x_ref, w1_ref, b1_ref, w2_ref, b2_ref, w3_ref, b3_ref, o_ref):
        # x_ref: (C_pad, N*HW) bf16 -- all batches, pixels on the lane axis.
        x = x_ref[...]

        # conv1 (1x1) + ReLU; fuse the bf16 downcast so the f32 r1 retires.
        r1 = jnp.dot(w1_ref[...], x, preferred_element_type=jnp.float32)   # (C1, N*HW)
        r1 = jnp.maximum(r1 + b1_ref[...], 0.0).astype(jnp.bfloat16)

        # conv2 (1x1) with BN1 folded into the weights/bias, then ReLU.
        h2 = jnp.dot(w2_ref[...], r1, preferred_element_type=jnp.float32)  # (C2, N*HW)
        h2 = jnp.maximum(h2 + b2_ref[...], 0.0)

        w3 = w3_ref[...]                                                   # (C2, NCP)
        b3 = b3_ref[...]                                                   # (1, NCP)

        # Per-batch global average pool (static lane-aligned slices, HW=2x128),
        # then the tiny BN2-folded classifier on VPU (broadcast-mul) + XLU
        # (sublane reduce).  Unrolled over the static batch size.
        rows = []
        for n in range(n_batch):
            seg = h2[:, n * hw:(n + 1) * hw]                               # (C2, HW)
            pooled = jnp.sum(seg, axis=1, keepdims=True) * inv_hw          # (C2, 1)
            rows.append(jnp.sum(pooled * w3, axis=0, keepdims=True) + b3)  # (1, NCP)

        logits = rows[0] if n_batch == 1 else jnp.concatenate(rows, axis=0)
        o_ref[...] = logits                                                # (N, NCP)

    return kernel


# ---------------------------------------------------------------------------
# Parameter preparation
# ---------------------------------------------------------------------------
def make_raw_params(key, num_channels, num_classes):
    """Deterministic synthetic parameters in PyTorch layout (out, in)."""
    C1, C2 = 128, 64
    ks = jax.random.split(key, 14)
    w1 = jax.random.normal(ks[0], (C1, num_channels), jnp.float32) * 0.1
    b1 = jax.random.normal(ks[1], (C1,), jnp.float32) * 0.1
    w2 = jax.random.normal(ks[2], (C2, C1), jnp.float32) * 0.1
    b2 = jax.random.normal(ks[3], (C2,), jnp.float32) * 0.1
    w3 = jax.random.normal(ks[4], (num_classes, C2), jnp.float32) * 0.1
    b3 = jax.random.normal(ks[5], (num_classes,), jnp.float32) * 0.1
    # BatchNorm (eval): gamma, beta, running_mean, running_var.
    g1 = 1.0 + 0.1 * jax.random.normal(ks[6], (C1,), jnp.float32)
    be1 = 0.1 * jax.random.normal(ks[7], (C1,), jnp.float32)
    m1 = 0.1 * jax.random.normal(ks[8], (C1,), jnp.float32)
    v1 = jnp.abs(1.0 + 0.1 * jax.random.normal(ks[9], (C1,), jnp.float32))
    g2 = 1.0 + 0.1 * jax.random.normal(ks[10], (C2,), jnp.float32)
    be2 = 0.1 * jax.random.normal(ks[11], (C2,), jnp.float32)
    m2 = 0.1 * jax.random.normal(ks[12], (C2,), jnp.float32)
    v2 = jnp.abs(1.0 + 0.1 * jax.random.normal(ks[13], (C2,), jnp.float32))
    return (w1, b1, g1, be1, m1, v1, w2, b2, g2, be2, m2, v2, w3, b3)


def fold_params(raw, num_channels, num_classes):
    """Fold BN into downstream convs, pad input channels to 8 sublanes and the
    classifier output to 128 lanes."""
    (w1, b1, g1, be1, m1, v1,
     w2, b2, g2, be2, m2, v2,
     w3, b3) = raw
    s1 = g1 / jnp.sqrt(v1 + EPS)
    t1 = be1 - m1 * s1
    s2 = g2 / jnp.sqrt(v2 + EPS)
    t2 = be2 - m2 * s2

    C1, C2 = w1.shape[0], w2.shape[0]
    CP = ((num_channels + 7) // 8) * 8                   # sublane-friendly K pad
    NCP = ((num_classes + LANE_PAD - 1) // LANE_PAD) * LANE_PAD

    # conv1 weights, input-channel padded with zeros (mathematically identity).
    w1p = jnp.zeros((C1, CP), jnp.bfloat16).at[:, :num_channels].set(
        w1.astype(jnp.bfloat16))                          # (C1, CP)
    b1c = b1.reshape(C1, 1).astype(jnp.float32)           # (C1, 1)
    # BN1 folded into conv2: w2 @ (s1*a1 + t1) + b2 = (w2*s1) @ a1 + (b2 + w2@t1).
    w2ft = (w2 * s1[None, :]).astype(jnp.bfloat16)        # (C2, C1)
    b2c = (b2 + w2 @ t1).reshape(C2, 1).astype(jnp.float32)
    # BN2 folded into conv3, stored as (C2, NC) and zero-padded on lanes.
    w3f = (s2[:, None] * w3.T).astype(jnp.float32)        # (C2, NC)
    b3f = (b3 + w3 @ t2).astype(jnp.float32)              # (NC,)
    w3f_pad = jnp.zeros((C2, NCP), jnp.float32).at[:, :num_classes].set(w3f)
    b3f_pad = jnp.zeros((1, NCP), jnp.float32).at[0, :num_classes].set(b3f)
    return (w1p, b1c, w2ft, b2c, w3f_pad, b3f_pad)


# ---------------------------------------------------------------------------
# Wrapper
# ---------------------------------------------------------------------------
def hyperspectral_cnn_forward(x_nchw, folded_params, num_classes):
    """x_nchw: (N, C, H, W) float32.  Returns (N, num_classes) float32."""
    N, C, H, W = x_nchw.shape
    HW = H * W

    w1p, b1c, w2ft, b2c, w3f, b3f = folded_params
    C1, CP = w1p.shape
    C2 = w2ft.shape[0]
    NCP = w3f.shape[1]

    # (N, C, H, W) -> (C, N*HW): one-time ~4 KiB transpose; batch folded into
    # the lane axis so the kernel runs as one single step.  Pad channels -> CP.
    x2d = jnp.transpose(x_nchw.reshape(N, C, HW), (1, 0, 2)).reshape(C, N * HW)
    xp = jnp.zeros((CP, N * HW), jnp.bfloat16).at[:C, :].set(
        x2d.astype(jnp.bfloat16))

    flops = 2 * N * HW * (C1 * CP + C2 * C1) + N * HW * C2
    bytes_accessed = (xp.size * 2 + w1p.size * 2 + w2ft.size * 2
                      + (b1c.size + b2c.size + w3f.size + b3f.size) * 4
                      + N * NCP * 4)

    vmem = lambda: pl.BlockSpec(memory_space=pltpu.MemorySpace.VMEM)

    out = pl.pallas_call(
        _make_kernel(N, HW),
        out_shape=jax.ShapeDtypeStruct((N, NCP), jnp.float32),
        in_specs=[vmem() for _ in range(7)],
        out_specs=vmem(),
        cost_estimate=pl.CostEstimate(flops=int(flops), transcendentals=0,
                                      bytes_accessed=int(bytes_accessed)),
    )(xp, w1p, b1c, w2ft, b2c, w3f, b3f)
    return out[:, :num_classes]


# ---------------------------------------------------------------------------
# References
# ---------------------------------------------------------------------------
def reference_folded(x_nchw, raw, num_classes):
    """Pure-JAX mirror of the kernel's exact numerics (folded params, bf16 matmuls)."""
    w1p, b1c, w2ft, b2c, w3f, b3f = fold_params(raw, x_nchw.shape[1], num_classes)
    N, C, H, W = x_nchw.shape
    HW = H * W
    CP = w1p.shape[1]
    x2d = jnp.transpose(x_nchw.reshape(N, C, HW), (1, 0, 2)).reshape(C, N * HW)
    xp = jnp.zeros((CP, N * HW), jnp.bfloat16).at[:C, :].set(
        x2d.astype(jnp.bfloat16))
    r1 = jnp.dot(w1p, xp, preferred_element_type=jnp.float32)
    r1 = jnp.maximum(r1 + b1c, 0.0).astype(jnp.bfloat16)
    h2 = jnp.dot(w2ft, r1, preferred_element_type=jnp.float32)
    h2 = jnp.maximum(h2 + b2c, 0.0)                      # (C2, N*HW)
    pooled = jnp.mean(h2.reshape(-1, N, HW), axis=2)     # (C2, N)
    logits = pooled.T @ w3f + b3f                        # (N, NCP)
    return logits[:, :num_classes]


def reference_module(x_nchw, raw):
    """Original PyTorch-module math in f32 (conv->relu->bn x2, conv, gap)."""
    (w1, b1, g1, be1, m1, v1,
     w2, b2, g2, be2, m2, v2,
     w3, b3) = raw
    N, C, H, W = x_nchw.shape
    x = x_nchw.reshape(N, C, H * W).astype(jnp.float32)
    h = jnp.einsum('oc,ncp->nop', w1, x) + b1[None, :, None]
    h = jnp.maximum(h, 0.0)
    h = ((h - m1[None, :, None]) / jnp.sqrt(v1 + EPS)[None, :, None]
         * g1[None, :, None] + be1[None, :, None])
    h = jnp.einsum('oc,ncp->nop', w2, h) + b2[None, :, None]
    h = jnp.maximum(h, 0.0)
    h = ((h - m2[None, :, None]) / jnp.sqrt(v2 + EPS)[None, :, None]
         * g2[None, :, None] + be2[None, :, None])
    h = jnp.einsum('oc,ncp->nop', w3, h) + b3[None, :, None]
    return jnp.mean(h, axis=2)                           # (N, NC)


if __name__ == "__main__":
    # Small config consistent with the module: num_channels=4, img_size=16,
    # num_classes=8, batch=2.
    N, C, H, W = 2, 4, 16, 16
    num_classes = 8

    key = jax.random.PRNGKey(0)
    kx, kp = jax.random.split(key)
    x = jax.random.normal(kx, (N, C, H, W), jnp.float32)
    raw = make_raw_params(kp, C, num_classes)
    folded = fold_params(raw, C, num_classes)

    out = hyperspectral_cnn_forward(x, folded, num_classes)
    out = jax.block_until_ready(out)
    assert out.shape == (N, num_classes)

    # Strict check: kernel vs a pure-JAX mirror of the same (folded, bf16) math.
    ref_strict = reference_folded(x, raw, num_classes)
    assert jnp.allclose(out, ref_strict, atol=1e-3, rtol=1e-3)

    # Semantic check: kernel vs the original module math in f32 (bf16 tolerance).
    ref_mod = reference_module(x, raw)
    assert jnp.allclose(out, ref_mod, atol=2e-2, rtol=2e-2)

    print("KERNEL_OK")
</pallas_src>

<mosaic_0001>
module attributes {stable_mosaic.version = 11 : i64} {
  func.func @kernel(%arg0: memref<8x512xbf16, #tpu.memory_space<vmem>>, %arg1: memref<128x8xbf16, #tpu.memory_space<vmem>>, %arg2: memref<128x1xf32, #tpu.memory_space<vmem>>, %arg3: memref<64x128xbf16, #tpu.memory_space<vmem>>, %arg4: memref<64x1xf32, #tpu.memory_space<vmem>>, %arg5: memref<64x128xf32, #tpu.memory_space<vmem>>, %arg6: memref<1x128xf32, #tpu.memory_space<vmem>>, %arg7: memref<2x128xf32, #tpu.memory_space<vmem>>) attributes {dimension_semantics = [], scalar_prefetch = 0 : i64, scratch_operands = 0 : i64, tpu.core_type = #tpu.core_type<tc>} {
    %c0 = arith.constant 0 : index
    %c0_0 = arith.constant 0 : index
    %0 = vector.load %arg0[%c0, %c0_0] : memref<8x512xbf16, #tpu.memory_space<vmem>>, vector<8x512xbf16>
    %c0_1 = arith.constant 0 : index
    %c0_2 = arith.constant 0 : index
    %1 = vector.load %arg1[%c0_1, %c0_2] : memref<128x8xbf16, #tpu.memory_space<vmem>>, vector<128x8xbf16>
    %cst = arith.constant dense<0.000000e+00> : vector<128x512xf32>
    %2 = tpu.matmul %1, %0, %cst {dimension_numbers = #tpu.dot_dimension_numbers<[1], [0], [0], [1], [0, 0, 1, 1], [], []>} : vector<128x8xbf16>, vector<8x512xbf16>, vector<128x512xf32> -> vector<128x512xf32>
    %c0_3 = arith.constant 0 : index
    %c0_4 = arith.constant 0 : index
    %3 = vector.load %arg2[%c0_3, %c0_4] : memref<128x1xf32, #tpu.memory_space<vmem>>, vector<128x1xf32>
    %4 = vector.broadcast %3 : vector<128x1xf32> to vector<128x512xf32>
    %5 = arith.addf %2, %4 : vector<128x512xf32>
    %cst_5 = arith.constant 0.000000e+00 : f32
    %6 = vector.broadcast %cst_5 : f32 to vector<128x512xf32>
    %7 = arith.maximumf %5, %6 : vector<128x512xf32>
    %8 = arith.truncf %7 : vector<128x512xf32> to vector<128x512xbf16>
    %c0_6 = arith.constant 0 : index
    %c0_7 = arith.constant 0 : index
    %9 = vector.load %arg3[%c0_6, %c0_7] : memref<64x128xbf16, #tpu.memory_space<vmem>>, vector<64x128xbf16>
    %cst_8 = arith.constant dense<0.000000e+00> : vector<64x512xf32>
    %10 = tpu.matmul %9, %8, %cst_8 {dimension_numbers = #tpu.dot_dimension_numbers<[1], [0], [0], [1], [0, 0, 1, 1], [], []>} : vector<64x128xbf16>, vector<128x512xbf16>, vector<64x512xf32> -> vector<64x512xf32>
    %c0_9 = arith.constant 0 : index
    %c0_10 = arith.constant 0 : index
    %11 = vector.load %arg4[%c0_9, %c0_10] : memref<64x1xf32, #tpu.memory_space<vmem>>, vector<64x1xf32>
    %12 = vector.broadcast %11 : vector<64x1xf32> to vector<64x512xf32>
    %13 = arith.addf %10, %12 : vector<64x512xf32>
    %cst_11 = arith.constant 0.000000e+00 : f32
    %14 = vector.broadcast %cst_11 : f32 to vector<64x512xf32>
    %15 = arith.maximumf %13, %14 : vector<64x512xf32>
    %c0_12 = arith.constant 0 : index
    %c0_13 = arith.constant 0 : index
    %16 = vector.load %arg5[%c0_12, %c0_13] : memref<64x128xf32, #tpu.memory_space<vmem>>, vector<64x128xf32>
    %c0_14 = arith.constant 0 : index
    %c0_15 = arith.constant 0 : index
    %17 = vector.load %arg6[%c0_14, %c0_15] : memref<1x128xf32, #tpu.memory_space<vmem>>, vector<1x128xf32>
    %18 = vector.extract_strided_slice %15 {offsets = [0, 0], sizes = [64, 256], strides = [1, 1]} : vector<64x512xf32> to vector<64x256xf32>
    %cst_16 = arith.constant dense<0.000000e+00> : vector<64xf32>
    %19 = vector.multi_reduction <add>, %18, %cst_16 [1] : vector<64x256xf32> to vector<64xf32>
    %20 = vector.shape_cast %19 : vector<64xf32> to vector<64x1xf32>
    %cst_17 = arith.constant 3.906250e-03 : f32
    %21 = vector.broadcast %cst_17 : f32 to vector<64x1xf32>
    %22 = arith.mulf %20, %21 : vector<64x1xf32>
    %23 = vector.broadcast %22 : vector<64x1xf32> to vector<64x128xf32>
    %24 = arith.mulf %23, %16 : vector<64x128xf32>
    %cst_18 = arith.constant dense<0.000000e+00> : vector<128xf32>
    %25 = vector.multi_reduction <add>, %24, %cst_18 [0] : vector<64x128xf32> to vector<128xf32>
    %26 = vector.shape_cast %25 : vector<128xf32> to vector<1x128xf32>
    %27 = arith.addf %26, %17 : vector<1x128xf32>
    %28 = vector.extract_strided_slice %15 {offsets = [0, 256], sizes = [64, 256], strides = [1, 1]} : vector<64x512xf32> to vector<64x256xf32>
    %cst_19 = arith.constant dense<0.000000e+00> : vector<64xf32>
    %29 = vector.multi_reduction <add>, %28, %cst_19 [1] : vector<64x256xf32> to vector<64xf32>
    %30 = vector.shape_cast %29 : vector<64xf32> to vector<64x1xf32>
    %cst_20 = arith.constant 3.906250e-03 : f32
    %31 = vector.broadcast %cst_20 : f32 to vector<64x1xf32>
    %32 = arith.mulf %30, %31 : vector<64x1xf32>
    %33 = vector.broadcast %32 : vector<64x1xf32> to vector<64x128xf32>
    %34 = arith.mulf %33, %16 : vector<64x128xf32>
    %cst_21 = arith.constant dense<0.000000e+00> : vector<128xf32>
    %35 = vector.multi_reduction <add>, %34, %cst_21 [0] : vector<64x128xf32> to vector<128xf32>
    %36 = vector.shape_cast %35 : vector<128xf32> to vector<1x128xf32>
    %37 = arith.addf %36, %17 : vector<1x128xf32>
    %38 = tpu.concatenate %27, %37 in 0 : vector<1x128xf32>, vector<1x128xf32> -> vector<2x128xf32>
    %c0_22 = arith.constant 0 : index
    %c0_23 = arith.constant 0 : index
    %39 = vector.load %arg7[%c0_22, %c0_23] : memref<2x128xf32, #tpu.memory_space<vmem>>, vector<2x128xf32>
    tpu.vector_store %arg7[%c0_22, %c0_23], %38 {strides = array<i32>} : memref<2x128xf32, #tpu.memory_space<vmem>>, vector<2x128xf32>,
    return
  }
}

</mosaic_0001>

<bundles_post_ra>
// kernel: tpu_custom_call.1
= control target key start
LH: loop header
LB: loop body
LE: loop exit
PB: predicated region body
PF: predicated region fallthrough
CT: control target
= control target key end

     0   :  { %vm217_vm0 = vcmask 1043456   ;;  %v1025_v6 = vmov 0   ;;  %vm192_vm1 = vcmask 64512   ;;  %s1262_s0 = inlined_call_operand.vmem [shape: bf16[8,512], index: 0, kind: input, shape index: {}]   ;;  %s1263_s1 = inlined_call_operand.vmem [shape: bf16[128,8], index: 1, kind: input, shape index: {}]   ;;  %s1264_s2 = inlined_call_operand.vmem [shape: f32[128,1], index: 2, kind: input, shape index: {}]   ;;  %s1265_s3 = inlined_call_operand.vmem [shape: bf16[64,128], index: 3, kind: input, shape index: {}]   ;;  %s1266_s4 = inlined_call_operand.vmem [shape: f32[64,1], index: 4, kind: input, shape index: {}]   ;;  %s1267_s5 = inlined_call_operand.vmem [shape: f32[64,128], index: 5, kind: input, shape index: {}]   ;;  %s1268_s6 = inlined_call_operand.vmem [shape: f32[1,128], index: 6, kind: input, shape index: {}]   ;;  %s1269_s7 = inlined_call_operand.hbm [shape: f32[2,128], index: 7, kind: output, shape index: {}]  }
   0x1   :  { %v28_v0 = vld [vmem:[%s1262_s0] sm:$0xff]  ;;  %v29_v1 = vld [vmem:[%s1262_s0 + $0x8] sm:$0xff]  ;;  %262 = vmatprep.mubr.bf16.mxu0 %v1025_v6  ;;  %375 = vmatprep.mubr.bf16.mxu1 %v1025_v6  ;;  %v48_v12 = vld [vmem:[%s1264_s2 + $0x10] sm:$0xff] }
   0x2   :  { %v956_v2 = vcombine.high %v28_v0, %v28_v0  ;;  %v958_v3 = vcombine.high %v29_v1, %v29_v1  ;;  %v955_v4 = vcombine.low %v28_v0, %v28_v0  ;;  %v957_v5 = vcombine.low %v29_v1, %v29_v1  ;;  %983 = vset.pattern.permute.xlu0 %v1025_v6  ;;  %v989_v9 = vld [vmem:[%s1263_s1] sm:$0xff]   ;;  %v47_v11 = vld [vmem:[%s1264_s2 + $0x8] sm:$0xff]  ;;  %v49_v13 = vld [vmem:[%s1264_s2 + $0x18] sm:$0xff] }
   0x3   :  { %v46_v10 = vld [vmem:[%s1264_s2] sm:$0xff]  ;;  %984 = vset.pattern.permute.xlu1 %v1025_v6  ;;  %v990_v14 = vld [vmem:[%s1263_s1 + $0x8] sm:$0xff]   ;;  %v52_v17 = vld [vmem:[%s1264_s2 + $0x30] sm:$0xff] }
   0x4   :  { %959 = vmatprep.subr.msk.bf16.mxu0 %vm217_vm0, %v956_v2  ;;  %968 = vmatprep.subr.msk.bf16.mxu1 %vm217_vm0, %v958_v3  ;;  %v219_v7 = vsel %vm217_vm0, %v955_v4, 0  ;;  %v225_v8 = vsel %vm217_vm0, %v957_v5, 0  ;;  %v50_v15 = vld [vmem:[%s1264_s2 + $0x20] sm:$0xff]  ;;  %v51_v16 = vld [vmem:[%s1264_s2 + $0x28] sm:$0xff]  ;;  %v53_v18 = vld [vmem:[%s1264_s2 + $0x38] sm:$0xff] }
   0x5   :  { %231 = vmatpush1.bf16.msra.mxu0 %v219_v7  ;;  %344 = vmatpush1.bf16.msra.mxu1 %v225_v8  ;;  %v991_v19 = vld [vmem:[%s1263_s1 + $0x10] sm:$0xff]   ;;  %v54_v20 = vld [vmem:[%s1264_s2 + $0x40] sm:$0xff] }
   0x6   :  { %64 = vperm.xlu0 %983, %v46_v10   ;;  %74 = vperm.xlu1 %984, %v48_v12  }
   0x8   :  { %960 = vmatmul.mubr.msk.bf16.vlgmr.msra.gmra.mrb[0].mxu0 %vm192_vm1, %v989_v9  ;;  %969 = vmatmul.mubr.msk.bf16.vlgmr.msra.gmra.mrb[0].mxu1 %vm192_vm1, %v989_v9 }
   0x9   :  { %272 = vmatprep.mubr.bf16.mxu0 %v1025_v6  ;;  %385 = vmatprep.mubr.bf16.mxu1 %v1025_v6 }
   0xa   :  { %69 = vperm.xlu0 %983, %v47_v11   ;;  %79 = vperm.xlu1 %984, %v49_v13  }
   0xe   :  { %84 = vperm.xlu0 %983, %v50_v15   ;;  %89 = vperm.xlu1 %984, %v51_v16  }
  0x10   :  { %961 = vmatmul.mubr.msk.bf16.gmra.mrb[4].mxu0 %vm192_vm1, %v990_v14  ;;  %970 = vmatmul.mubr.msk.bf16.gmra.mrb[4].mxu1 %vm192_vm1, %v990_v14 }
  0x11   :  { %282 = vmatprep.mubr.bf16.mxu0 %v1025_v6  ;;  %395 = vmatprep.mubr.bf16.mxu1 %v1025_v6 }
  0x12   :  { %94 = vperm.xlu0 %983, %v52_v17  }
  0x13   :  { %12 = vsyncpa [#allocation3], 0  ;;  %99 = vperm.xlu1 %984, %v53_v18   ;;  %v55_v21 = vld [vmem:[%s1264_s2 + $0x48] sm:$0xff]  ;;  %v56_v22 = vld [vmem:[%s1264_s2 + $0x50] sm:$0xff]  ;;  %s1026_s16 = smov [#allocation2]   ;;  %vm930_vm2 = vcmask 1040384  }
  0x14   :  { %v57_v23 = vld [vmem:[%s1264_s2 + $0x58] sm:$0xff]  ;;  %v58_v25 = vld [vmem:[%s1264_s2 + $0x60] sm:$0xff]  ;;  %v59_v26 = vld [vmem:[%s1264_s2 + $0x68] sm:$0xff]  ;;  %s939_s17 = sshll.u32 %s1026_s16, 4  ;;  %s940_s17 = int_to_ptr.vmem [resolvable:$true] %s939_s17 }
  0x15   :  { %v992_v24 = vld [vmem:[%s1263_s1 + $0x18] sm:$0xff]   ;;  %v60_v27 = vld [vmem:[%s1264_s2 + $0x70] sm:$0xff]  ;;  %v993_v29 = vld [vmem:[%s1263_s1 + $0x20] sm:$0xff]   ;;  %s1001_s18 = scalar_lea.vmem %s940_s17, 32  ;;  %p1006_p1 = scmp.lt.s32.totalorder %s940_s17, %s940_s17 }
  0x16   :  { %104 = vperm.xlu0 %983, %v54_v20   ;;  %v61_v28 = vld [vmem:[%s1264_s2 + $0x78] sm:$0xff]  ;;  %v560_v30 = vld [vmem:[%s1266_s4] sm:$0xff]  ;;  %v561_v31 = vld [vmem:[%s1266_s4 + $0x8] sm:$0xff]  ;;  %p1002_p0 = scmp.ne.s32.totalorder %s940_s17, %s1001_s18  ;;  %p1007_p2 = scmp.lt.s32.totalorder %s1001_s18, %s1001_s18 }
  0x17   :  { %109 = vperm.xlu1 %984, %v55_v21   ;;  %v562_v32 = vld [vmem:[%s1266_s4 + $0x10] sm:$0xff]  ;;  %v563_v33 = vld [vmem:[%s1266_s4 + $0x18] sm:$0xff]  ;;  %v994_v34 = vld [vmem:[%s1263_s1 + $0x28] sm:$0xff]  }
  0x18   :  { %962 = vmatmul.mubr.msk.bf16.gmra.mrb[8].mxu0 %vm192_vm1, %v991_v19  ;;  %971 = vmatmul.mubr.msk.bf16.gmra.mrb[8].mxu1 %vm192_vm1, %v991_v19  ;;  %v564_v35 = vld [vmem:[%s1266_s4 + $0x20] sm:$0xff]  ;;  %v565_v36 = vld [vmem:[%s1266_s4 + $0x28] sm:$0xff]  ;;  %v566_v37 = vld [vmem:[%s1266_s4 + $0x30] sm:$0xff]  ;;  %p1008_p3 = por %p1007_p2, %p1006_p1 }
  0x19   :  { %292 = vmatprep.mubr.bf16.mxu0 %v1025_v6  ;;  %405 = vmatprep.mubr.bf16.mxu1 %v1025_v6  ;;  %v567_v38 = vld [vmem:[%s1266_s4 + $0x38] sm:$0xff]  ;;  %v995_v39 = vld [vmem:[%s1263_s1 + $0x30] sm:$0xff]  }
  0x1a   :  { %114 = vperm.xlu0 %983, %v56_v22   ;;  %v996_v40 = vld [vmem:[%s1263_s1 + $0x38] sm:$0xff]   ;;  %p1009_p4 = pnand %p1008_p3, %p1002_p0 }
  0x1b   :  { %119 = vperm.xlu1 %984, %v57_v23  }
  0x1e   :  { %124 = vperm.xlu0 %983, %v58_v25  }
  0x1f   :  { %129 = vperm.xlu1 %984, %v59_v26  }
  0x20   :  { %963 = vmatmul.mubr.msk.bf16.gmra.mrb[12].mxu0 %vm192_vm1, %v992_v24  ;;  %972 = vmatmul.mubr.msk.bf16.gmra.mrb[12].mxu1 %vm192_vm1, %v992_v24 }
  0x21   :  { %302 = vmatprep.mubr.bf16.mxu0 %v1025_v6  ;;  %415 = vmatprep.mubr.bf16.mxu1 %v1025_v6 }
  0x22   :  { %134 = vperm.xlu0 %983, %v60_v27  }
  0x23   :  { %139 = vperm.xlu1 %984, %v61_v28  }
  0x26   :  { %570 = vperm.xlu0 %983, %v560_v30  }
  0x27   :  { %575 = vperm.xlu1 %984, %v561_v31  }
  0x28   :  { %964 = vmatmul.mubr.msk.bf16.gmra.mrb[16].mxu0 %vm192_vm1, %v993_v29  ;;  %973 = vmatmul.mubr.msk.bf16.gmra.mrb[16].mxu1 %vm192_vm1, %v993_v29 }
  0x29   :  { %312 = vmatprep.mubr.bf16.mxu0 %v1025_v6  ;;  %425 = vmatprep.mubr.bf16.mxu1 %v1025_v6 }
  0x2a   :  { %580 = vperm.xlu0 %983, %v562_v32  }
  0x2b   :  { %585 = vperm.xlu1 %984, %v563_v33  }
  0x2e   :  { %590 = vperm.xlu0 %983, %v564_v35  }
  0x2f   :  { %595 = vperm.xlu1 %984, %v565_v36  }
  0x30   :  { %965 = vmatmul.mubr.msk.bf16.gmra.mrb[20].mxu0 %vm192_vm1, %v994_v34  ;;  %974 = vmatmul.mubr.msk.bf16.gmra.mrb[20].mxu1 %vm192_vm1, %v994_v34 }
  0x31   :  { %322 = vmatprep.mubr.bf16.mxu0 %v1025_v6  ;;  %435 = vmatprep.mubr.bf16.mxu1 %v1025_v6 }
  0x32   :  { %600 = vperm.xlu0 %983, %v566_v37  }
  0x33   :  { %605 = vperm.xlu1 %984, %v567_v38  }
  0x38   :  { %966 = vmatmul.mubr.msk.bf16.gmra.mrb[24].mxu0 %vm192_vm1, %v995_v39  ;;  %975 = vmatmul.mubr.msk.bf16.gmra.mrb[24].mxu1 %vm192_vm1, %v995_v39 }
  0x39   :  { %332 = vmatprep.mubr.bf16.mxu0 %v1025_v6  ;;  %445 = vmatprep.mubr.bf16.mxu1 %v1025_v6 }
  0x40   :  { %967 = vmatmul.mubr.msk.bf16.gmra.mrb[28].mxu0 %vm192_vm1, %v996_v40  ;;  %976 = vmatmul.mubr.msk.bf16.gmra.mrb[28].mxu1 %vm192_vm1, %v996_v40 }
  0x41   :  { %664 = vmatprep.mubr.bf16.mxu0 %v1025_v6  ;;  %737 = vmatprep.mubr.bf16.mxu1 %v1025_v6 }
  0x85   :  { %v65_v41 = vpop.permute.xlu0 %64  ;;  %v75_v43 = vpop.permute.xlu1 %74 }
  0x89   :  { %v70_v42 = vpop.permute.xlu0 %69  ;;  %v80_v4 = vpop.permute.xlu1 %79 }
  0x8d   :  { %v85_v34 = vpop.permute.xlu0 %84  ;;  %v90_v35 = vpop.permute.xlu1 %89 }
  0xdb   :  { %v264_v44 = vpop.f32.mrb[0].mxu0  ;;  %v377_v45 = vpop.f32.mrb[0].mxu1 }
  0xdc   :  { %v265_v46 = vadd.f32 %v264_v44, %v65_v41  ;;  %v378_v47 = vadd.f32 %v377_v45, %v65_v41  ;;  %v266_v48 = vpop.f32.mrb[1].mxu0  ;;  %v379_v49 = vpop.f32.mrb[1].mxu1 }
  0xdd   :  { %v267_v50 = vadd.f32 %v266_v48, %v65_v41  ;;  %v380_v51 = vadd.f32 %v379_v49, %v65_v41  ;;  %v268_v52 = vpop.f32.mrb[2].mxu0  ;;  %v381_v53 = vpop.f32.mrb[2].mxu1 }
  0xde   :  { %v456_v54 = vmax.f32 %v265_v46, 0.0  ;;  %v269_v55 = vadd.f32 %v268_v52, %v70_v42  ;;  %v382_v56 = vadd.f32 %v381_v53, %v70_v42  ;;  %v270_v57 = vpop.f32.mrb[3].mxu0  ;;  %v383_v58 = vpop.f32.mrb[3].mxu1  ;;  %v458_v62 = vmax.f32 %v378_v47, 0.0 }
  0xdf   :  { %v457_v59 = vmax.f32 %v267_v50, 0.0  ;;  %v271_v60 = vadd.f32 %v270_v57, %v70_v42  ;;  %v384_v61 = vadd.f32 %v383_v58, %v70_v42  ;;  %v459_v1 = vmax.f32 %v380_v51, 0.0 }
  0xe0   :  { %v460_v63 = vmax.f32 %v269_v55, 0.0  ;;  %v462_v0 = vmax.f32 %v382_v56, 0.0 }
  0xe1   :  { %v461_v2 = vmax.f32 %v271_v60, 0.0  ;;  %v463_v3 = vmax.f32 %v384_v61, 0.0 }
  0xe2   :  { %v520_v5 = vpack.c.bf16 %v460_v63, %v456_v54  ;;  %v522_v7 = vpack.c.bf16 %v462_v0, %v458_v62  ;;  %v95_v0 = vpop.permute.xlu0 %94 }
  0xe3   :  { %v521_v8 = vpack.c.bf16 %v461_v2, %v457_v59  ;;  %v523_v9 = vpack.c.bf16 %v463_v3, %v459_v1  ;;  %v274_v10 = vpop.f32.mrb[4].mxu0  ;;  %v387_v11 = vpop.f32.mrb[4].mxu1 }
  0xe4   :  { %v275_v12 = vadd.f32 %v274_v10, %v75_v43  ;;  %v388_v13 = vadd.f32 %v387_v11, %v75_v43  ;;  %v276_v14 = vpop.f32.mrb[5].mxu0  ;;  %v389_v15 = vpop.f32.mrb[5].mxu1 }
  0xe5   :  { %v277_v16 = vadd.f32 %v276_v14, %v75_v43  ;;  %v390_v17 = vadd.f32 %v389_v15, %v75_v43  ;;  %v278_v18 = vpop.f32.mrb[6].mxu0  ;;  %v391_v19 = vpop.f32.mrb[6].mxu1  ;;  %632 = vmatprep.subr.bf16.mxu0 %v521_v8  ;;  %705 = vmatprep.subr.bf16.mxu1 %v523_v9 }
  0xe6   :  { %v464_v20 = vmax.f32 %v275_v12, 0.0  ;;  %v279_v21 = vadd.f32 %v278_v18, %v80_v4  ;;  %v392_v22 = vadd.f32 %v391_v19, %v80_v4  ;;  %v280_v23 = vpop.f32.mrb[7].mxu0  ;;  %v393_v24 = vpop.f32.mrb[7].mxu1  ;;  %633 = vmatpush1.bf16.msra.mxu0 %v520_v5  ;;  %706 = vmatpush1.bf16.msra.mxu1 %v522_v7  ;;  %v466_v28 = vmax.f32 %v388_v13, 0.0 }
  0xe7   :  { %v465_v25 = vmax.f32 %v277_v16, 0.0  ;;  %v281_v26 = vadd.f32 %v280_v23, %v80_v4  ;;  %v394_v27 = vadd.f32 %v393_v24, %v80_v4  ;;  %v467_v31 = vmax.f32 %v390_v17, 0.0  ;;  %v100_v1 = vpop.permute.xlu1 %99 }
  0xe8   :  { %v468_v29 = vmax.f32 %v279_v21, 0.0  ;;  %v470_v30 = vmax.f32 %v392_v22, 0.0 }
  0xe9   :  { %v469_v32 = vmax.f32 %v281_v26, 0.0  ;;  %v471_v33 = vmax.f32 %v394_v27, 0.0 }
  0xea   :  { %v524_v36 = vpack.c.bf16 %v468_v29, %v464_v20  ;;  %v526_v37 = vpack.c.bf16 %v470_v30, %v466_v28 }
  0xeb   :  { %v525_v38 = vpack.c.bf16 %v469_v32, %v465_v25  ;;  %v527_v39 = vpack.c.bf16 %v471_v33, %v467_v31  ;;  %v284_v40 = vpop.f32.mrb[8].mxu0  ;;  %v397_v41 = vpop.f32.mrb[8].mxu1 }
  0xec   :  { %v285_v42 = vadd.f32 %v284_v40, %v85_v34  ;;  %v398_v43 = vadd.f32 %v397_v41, %v85_v34  ;;  %v286_v44 = vpop.f32.mrb[9].mxu0  ;;  %v399_v45 = vpop.f32.mrb[9].mxu1 }
  0xed   :  { %v287_v46 = vadd.f32 %v286_v44, %v85_v34  ;;  %v400_v47 = vadd.f32 %v399_v45, %v85_v34  ;;  %v288_v48 = vpop.f32.mrb[10].mxu0  ;;  %v401_v49 = vpop.f32.mrb[10].mxu1  ;;  %634 = vmatprep.subr.bf16.mxu0 %v525_v38  ;;  %707 = vmatprep.subr.bf16.mxu1 %v527_v39 }
  0xee   :  { %v472_v50 = vmax.f32 %v285_v42, 0.0  ;;  %v289_v51 = vadd.f32 %v288_v48, %v90_v35  ;;  %v402_v52 = vadd.f32 %v401_v49, %v90_v35  ;;  %v290_v53 = vpop.f32.mrb[11].mxu0  ;;  %v403_v54 = vpop.f32.mrb[11].mxu1  ;;  %635 = vmatpush1.bf16.msra.mxu0 %v524_v36  ;;  %708 = vmatpush1.bf16.msra.mxu1 %v526_v37  ;;  %v474_v58 = vmax.f32 %v398_v43, 0.0 }
  0xef   :  { %v473_v55 = vmax.f32 %v287_v46, 0.0  ;;  %v291_v56 = vadd.f32 %v290_v53, %v90_v35  ;;  %v404_v57 = vadd.f32 %v403_v54, %v90_v35  ;;  %v475_v61 = vmax.f32 %v400_v47, 0.0  ;;  %v105_v31 = vpop.permute.xlu0 %104  ;;  %v110_v32 = vpop.permute.xlu1 %109 }
  0xf0   :  { %v476_v59 = vmax.f32 %v289_v51, 0.0  ;;  %v478_v60 = vmax.f32 %v402_v52, 0.0 }
  0xf1   :  { %v477_v62 = vmax.f32 %v291_v56, 0.0  ;;  %v479_v63 = vmax.f32 %v404_v57, 0.0 }
  0xf2   :  { %v528_v2 = vpack.c.bf16 %v476_v59, %v472_v50  ;;  %v530_v3 = vpack.c.bf16 %v478_v60, %v474_v58 }
  0xf3   :  { %v529_v4 = vpack.c.bf16 %v477_v62, %v473_v55  ;;  %v531_v5 = vpack.c.bf16 %v479_v63, %v475_v61  ;;  %v294_v7 = vpop.f32.mrb[12].mxu0  ;;  %v407_v8 = vpop.f32.mrb[12].mxu1 }
  0xf4   :  { %v295_v9 = vadd.f32 %v294_v7, %v95_v0  ;;  %v408_v10 = vadd.f32 %v407_v8, %v95_v0  ;;  %v296_v11 = vpop.f32.mrb[13].mxu0  ;;  %v409_v12 = vpop.f32.mrb[13].mxu1 }
  0xf5   :  { %v297_v13 = vadd.f32 %v296_v11, %v95_v0  ;;  %v410_v14 = vadd.f32 %v409_v12, %v95_v0  ;;  %v298_v15 = vpop.f32.mrb[14].mxu0  ;;  %v411_v16 = vpop.f32.mrb[14].mxu1  ;;  %636 = vmatprep.subr.bf16.mxu0 %v529_v4  ;;  %709 = vmatprep.subr.bf16.mxu1 %v531_v5 }
  0xf6   :  { %v480_v17 = vmax.f32 %v295_v9, 0.0  ;;  %v299_v18 = vadd.f32 %v298_v15, %v100_v1  ;;  %v412_v19 = vadd.f32 %v411_v16, %v100_v1  ;;  %v300_v20 = vpop.f32.mrb[15].mxu0  ;;  %v413_v21 = vpop.f32.mrb[15].mxu1  ;;  %637 = vmatpush1.bf16.msra.mxu0 %v528_v2  ;;  %710 = vmatpush1.bf16.msra.mxu1 %v530_v3  ;;  %v482_v25 = vmax.f32 %v408_v10, 0.0 }
  0xf7   :  { %v481_v22 = vmax.f32 %v297_v13, 0.0  ;;  %v301_v23 = vadd.f32 %v300_v20, %v100_v1  ;;  %v414_v24 = vadd.f32 %v413_v21, %v100_v1  ;;  %v483_v28 = vmax.f32 %v410_v14, 0.0  ;;  %v115_v61 = vpop.permute.xlu0 %114  ;;  %v120_v62 = vpop.permute.xlu1 %119 }
  0xf8   :  { %v484_v26 = vmax.f32 %v299_v18, 0.0  ;;  %v486_v27 = vmax.f32 %v412_v19, 0.0 }
  0xf9   :  { %v485_v29 = vmax.f32 %v301_v23, 0.0  ;;  %v487_v30 = vmax.f32 %v414_v24, 0.0 }
  0xfa   :  { %v532_v33 = vpack.c.bf16 %v484_v26, %v480_v17  ;;  %v534_v34 = vpack.c.bf16 %v486_v27, %v482_v25 }
  0xfb   :  { %v533_v35 = vpack.c.bf16 %v485_v29, %v481_v22  ;;  %v535_v36 = vpack.c.bf16 %v487_v30, %v483_v28  ;;  %v304_v37 = vpop.f32.mrb[16].mxu0  ;;  %v417_v38 = vpop.f32.mrb[16].mxu1 }
  0xfc   :  { %v305_v39 = vadd.f32 %v304_v37, %v105_v31  ;;  %v418_v40 = vadd.f32 %v417_v38, %v105_v31  ;;  %v306_v41 = vpop.f32.mrb[17].mxu0  ;;  %v419_v42 = vpop.f32.mrb[17].mxu1 }
  0xfd   :  { %v307_v43 = vadd.f32 %v306_v41, %v105_v31  ;;  %v420_v44 = vadd.f32 %v419_v42, %v105_v31  ;;  %v308_v45 = vpop.f32.mrb[18].mxu0  ;;  %v421_v46 = vpop.f32.mrb[18].mxu1  ;;  %638 = vmatprep.subr.bf16.mxu0 %v533_v35  ;;  %711 = vmatprep.subr.bf16.mxu1 %v535_v36 }
  0xfe   :  { %v309_v47 = vadd.f32 %v308_v45, %v110_v32  ;;  %v422_v48 = vadd.f32 %v421_v46, %v110_v32  ;;  %v310_v49 = vpop.f32.mrb[19].mxu0  ;;  %v423_v50 = vpop.f32.mrb[19].mxu1  ;;  %639 = vmatpush1.bf16.msra.mxu0 %v532_v33  ;;  %712 = vmatpush1.bf16.msra.mxu1 %v534_v34  ;;  %v488_v53 = vmax.f32 %v305_v39, 0.0  ;;  %v490_v54 = vmax.f32 %v418_v40, 0.0 }
  0xff   :  { %v311_v51 = vadd.f32 %v310_v49, %v110_v32  ;;  %v424_v52 = vadd.f32 %v423_v50, %v110_v32  ;;  %v489_v57 = vmax.f32 %v307_v43, 0.0  ;;  %v491_v58 = vmax.f32 %v420_v44, 0.0  ;;  %v125_v28 = vpop.permute.xlu0 %124  ;;  %v130_v29 = vpop.permute.xlu1 %129 }
 0x100   :  { %v492_v55 = vmax.f32 %v309_v47, 0.0  ;;  %v494_v56 = vmax.f32 %v422_v48, 0.0 }
 0x101   :  { %v493_v59 = vmax.f32 %v311_v51, 0.0  ;;  %v495_v60 = vmax.f32 %v424_v52, 0.0 }
 0x102   :  { %v536_v63 = vpack.c.bf16 %v492_v55, %v488_v53  ;;  %v538_v0 = vpack.c.bf16 %v494_v56, %v490_v54 }
 0x103   :  { %v537_v1 = vpack.c.bf16 %v493_v59, %v489_v57  ;;  %v539_v2 = vpack.c.bf16 %v495_v60, %v491_v58  ;;  %v314_v3 = vpop.f32.mrb[20].mxu0  ;;  %v427_v4 = vpop.f32.mrb[20].mxu1 }
 0x104   :  { %v315_v5 = vadd.f32 %v314_v3, %v115_v61  ;;  %v428_v7 = vadd.f32 %v427_v4, %v115_v61  ;;  %v316_v8 = vpop.f32.mrb[21].mxu0  ;;  %v429_v9 = vpop.f32.mrb[21].mxu1 }
 0x105   :  { %v317_v10 = vadd.f32 %v316_v8, %v115_v61  ;;  %v430_v11 = vadd.f32 %v429_v9, %v115_v61  ;;  %v318_v12 = vpop.f32.mrb[22].mxu0  ;;  %v431_v13 = vpop.f32.mrb[22].mxu1  ;;  %640 = vmatprep.subr.bf16.mxu0 %v537_v1  ;;  %713 = vmatprep.subr.bf16.mxu1 %v539_v2 }
 0x106   :  { %v319_v14 = vadd.f32 %v318_v12, %v120_v62  ;;  %v432_v15 = vadd.f32 %v431_v13, %v120_v62  ;;  %v320_v16 = vpop.f32.mrb[23].mxu0  ;;  %v433_v17 = vpop.f32.mrb[23].mxu1  ;;  %641 = vmatpush1.bf16.msra.mxu0 %v536_v63  ;;  %714 = vmatpush1.bf16.msra.mxu1 %v538_v0  ;;  %v496_v20 = vmax.f32 %v315_v5, 0.0  ;;  %v498_v21 = vmax.f32 %v428_v7, 0.0 }
 0x107   :  { %v321_v18 = vadd.f32 %v320_v16, %v120_v62  ;;  %v434_v19 = vadd.f32 %v433_v17, %v120_v62  ;;  %v497_v24 = vmax.f32 %v317_v10, 0.0  ;;  %v499_v25 = vmax.f32 %v430_v11, 0.0  ;;  %v135_v58 = vpop.permute.xlu0 %134  ;;  %v140_v59 = vpop.permute.xlu1 %139 }
 0x108   :  { %v500_v22 = vmax.f32 %v319_v14, 0.0  ;;  %v502_v23 = vmax.f32 %v432_v15, 0.0 }
 0x109   :  { %v501_v26 = vmax.f32 %v321_v18, 0.0  ;;  %v503_v27 = vmax.f32 %v434_v19, 0.0 }
 0x10a   :  { %v540_v30 = vpack.c.bf16 %v500_v22, %v496_v20  ;;  %v542_v31 = vpack.c.bf16 %v502_v23, %v498_v21 }
 0x10b   :  { %v541_v32 = vpack.c.bf16 %v501_v26, %v497_v24  ;;  %v543_v33 = vpack.c.bf16 %v503_v27, %v499_v25  ;;  %v324_v34 = vpop.f32.mrb[24].mxu0  ;;  %v437_v35 = vpop.f32.mrb[24].mxu1 }
 0x10c   :  { %v325_v36 = vadd.f32 %v324_v34, %v125_v28  ;;  %v438_v37 = vadd.f32 %v437_v35, %v125_v28  ;;  %v326_v38 = vpop.f32.mrb[25].mxu0  ;;  %v439_v39 = vpop.f32.mrb[25].mxu1 }
 0x10d   :  { %v327_v40 = vadd.f32 %v326_v38, %v125_v28  ;;  %v440_v41 = vadd.f32 %v439_v39, %v125_v28  ;;  %v328_v42 = vpop.f32.mrb[26].mxu0  ;;  %v441_v43 = vpop.f32.mrb[26].mxu1  ;;  %642 = vmatprep.subr.bf16.mxu0 %v541_v32  ;;  %715 = vmatprep.subr.bf16.mxu1 %v543_v33  ;;  %v1000_v32 = vld [vmem:[%s1265_s3 + $0x18] sm:$0xff]  }
 0x10e   :  { %v329_v44 = vadd.f32 %v328_v42, %v130_v29  ;;  %v442_v45 = vadd.f32 %v441_v43, %v130_v29  ;;  %v330_v46 = vpop.f32.mrb[27].mxu0  ;;  %v443_v47 = vpop.f32.mrb[27].mxu1  ;;  %643 = vmatpush1.bf16.msra.mxu0 %v540_v30  ;;  %716 = vmatpush1.bf16.msra.mxu1 %v542_v31  ;;  %v504_v50 = vmax.f32 %v325_v36, 0.0  ;;  %v506_v51 = vmax.f32 %v438_v37, 0.0  ;;  %v998_v30 = vld [vmem:[%s1265_s3 + $0x8] sm:$0xff]   ;;  %v999_v31 = vld [vmem:[%s1265_s3 + $0x10] sm:$0xff]  }
 0x10f   :  { %v331_v48 = vadd.f32 %v330_v46, %v130_v29  ;;  %v444_v49 = vadd.f32 %v443_v47, %v130_v29  ;;  %v505_v54 = vmax.f32 %v327_v40, 0.0  ;;  %v507_v55 = vmax.f32 %v440_v41, 0.0  ;;  %v997_v29 = vld [vmem:[%s1265_s3] sm:$0xff]   ;;  %v571_v33 = vpop.permute.xlu0 %570  ;;  %v576_v34 = vpop.permute.xlu1 %575 }
 0x110   :  { %v508_v52 = vmax.f32 %v329_v44, 0.0  ;;  %v510_v53 = vmax.f32 %v442_v45, 0.0 }
 0x111   :  { %v509_v56 = vmax.f32 %v331_v48, 0.0  ;;  %v511_v57 = vmax.f32 %v444_v49, 0.0 }
 0x112   :  { %v544_v60 = vpack.c.bf16 %v508_v52, %v504_v50  ;;  %v546_v61 = vpack.c.bf16 %v510_v53, %v506_v51 }
 0x113   :  { %v545_v62 = vpack.c.bf16 %v509_v56, %v505_v54  ;;  %v547_v63 = vpack.c.bf16 %v511_v57, %v507_v55  ;;  %v334_v0 = vpop.f32.mrb[28].mxu0  ;;  %v447_v1 = vpop.f32.mrb[28].mxu1 }
 0x114   :  { %v335_v2 = vadd.f32 %v334_v0, %v135_v58  ;;  %v448_v3 = vadd.f32 %v447_v1, %v135_v58  ;;  %v336_v4 = vpop.f32.mrb[29].mxu0  ;;  %v449_v5 = vpop.f32.mrb[29].mxu1 }
 0x115   :  { %v337_v7 = vadd.f32 %v336_v4, %v135_v58  ;;  %v450_v8 = vadd.f32 %v449_v5, %v135_v58  ;;  %v338_v9 = vpop.f32.mrb[30].mxu0  ;;  %v451_v10 = vpop.f32.mrb[30].mxu1  ;;  %644 = vmatprep.subr.bf16.mxu0 %v545_v62  ;;  %717 = vmatprep.subr.bf16.mxu1 %v547_v63 }
 0x116   :  { %v339_v11 = vadd.f32 %v338_v9, %v140_v59  ;;  %v452_v12 = vadd.f32 %v451_v10, %v140_v59  ;;  %v340_v13 = vpop.f32.mrb[31].mxu0  ;;  %v453_v14 = vpop.f32.mrb[31].mxu1  ;;  %645 = vmatpush1.bf16.msra.mxu0 %v544_v60  ;;  %718 = vmatpush1.bf16.msra.mxu1 %v546_v61  ;;  %v512_v17 = vmax.f32 %v335_v2, 0.0  ;;  %v514_v18 = vmax.f32 %v448_v3, 0.0 }
 0x117   :  { %v341_v15 = vadd.f32 %v340_v13, %v140_v59  ;;  %v454_v16 = vadd.f32 %v453_v14, %v140_v59  ;;  %v513_v21 = vmax.f32 %v337_v7, 0.0  ;;  %v515_v22 = vmax.f32 %v450_v8, 0.0  ;;  %v581_v60 = vpop.permute.xlu0 %580  ;;  %v586_v61 = vpop.permute.xlu1 %585 }
 0x118   :  { %v516_v19 = vmax.f32 %v339_v11, 0.0  ;;  %v518_v20 = vmax.f32 %v452_v12, 0.0 }
 0x119   :  { %v517_v23 = vmax.f32 %v341_v15, 0.0  ;;  %v519_v24 = vmax.f32 %v454_v16, 0.0 }
 0x11a   :  { %v548_v25 = vpack.c.bf16 %v516_v19, %v512_v17  ;;  %v550_v26 = vpack.c.bf16 %v518_v20, %v514_v18 }
 0x11b   :  { %v549_v27 = vpack.c.bf16 %v517_v23, %v513_v21  ;;  %v551_v28 = vpack.c.bf16 %v519_v24, %v515_v22 }
 0x11d   :  { %646 = vmatprep.subr.bf16.mxu0 %v549_v27  ;;  %719 = vmatprep.subr.bf16.mxu1 %v551_v28  ;;  %v591_v27 = vpop.permute.xlu0 %590  ;;  %v596_v28 = vpop.permute.xlu1 %595 }
 0x11e   :  { %647 = vmatpush1.bf16.msra.mxu0 %v548_v25  ;;  %720 = vmatpush1.bf16.msra.mxu1 %v550_v26 }
 0x121   :  { %665 = vmatmul.mubr.bf16.vlgmr.msra.gmra.mrb[32].mxu0 %v997_v29  ;;  %738 = vmatmul.mubr.bf16.vlgmr.msra.gmra.mrb[32].mxu1 %v997_v29 }
 0x122   :  { %674 = vmatprep.mubr.bf16.mxu0 %v1025_v6  ;;  %747 = vmatprep.mubr.bf16.mxu1 %v1025_v6 }
 0x129   :  { %675 = vmatmul.mubr.bf16.gmra.mrb[36].mxu0 %v998_v30  ;;  %748 = vmatmul.mubr.bf16.gmra.mrb[36].mxu1 %v998_v30 }
 0x12a   :  { %684 = vmatprep.mubr.bf16.mxu0 %v1025_v6  ;;  %757 = vmatprep.mubr.bf16.mxu1 %v1025_v6 }
 0x131   :  { %685 = vmatmul.mubr.bf16.gmra.mrb[40].mxu0 %v999_v31  ;;  %758 = vmatmul.mubr.bf16.gmra.mrb[40].mxu1 %v999_v31 }
 0x132   :  { %694 = vmatprep.mubr.bf16.mxu0 %v1025_v6  ;;  %767 = vmatprep.mubr.bf16.mxu1 %v1025_v6 }
 0x139   :  { %695 = vmatmul.mubr.bf16.gmra.mrb[44].mxu0 %v1000_v32  ;;  %768 = vmatmul.mubr.bf16.gmra.mrb[44].mxu1 %v1000_v32 }
 0x1f4   :  { %v666_v35 = vpop.f32.mrb[32].mxu0  ;;  %v739_v36 = vpop.f32.mrb[32].mxu1 }
 0x1f5   :  { %v667_v37 = vadd.f32 %v666_v35, %v571_v33  ;;  %v740_v38 = vadd.f32 %v739_v36, %v571_v33  ;;  %v668_v39 = vpop.f32.mrb[33].mxu0  ;;  %v741_v40 = vpop.f32.mrb[33].mxu1 }
 0x1f6   :  { %v669_v41 = vadd.f32 %v668_v39, %v571_v33  ;;  %v742_v42 = vadd.f32 %v741_v40, %v571_v33  ;;  %v670_v43 = vpop.f32.mrb[34].mxu0  ;;  %v743_v44 = vpop.f32.mrb[34].mxu1 }
 0x1f7   :  { %v778_v45 = vmax.f32 %v667_v37, 0.0  ;;  %v780_v6 = vmax.f32 %v740_v38, 0.0  ;;  %v671_v46 = vadd.f32 %v670_v43, %v576_v34  ;;  %v744_v47 = vadd.f32 %v743_v44, %v576_v34  ;;  %v672_v48 = vpop.f32.mrb[35].mxu0  ;;  %v745_v49 = vpop.f32.mrb[35].mxu1 }
 0x1f8   :  { %v779_v50 = vmax.f32 %v669_v41, 0.0  ;;  %v781_v51 = vmax.f32 %v742_v42, 0.0  ;;  %v673_v52 = vadd.f32 %v672_v48, %v576_v34  ;;  %v746_v53 = vadd.f32 %v745_v49, %v576_v34 }
 0x1f9   :  { %v782_v54 = vmax.f32 %v671_v46, 0.0  ;;  %v784_v55 = vmax.f32 %v744_v47, 0.0 }
 0x1fa   :  { %v783_v56 = vmax.f32 %v673_v52, 0.0  ;;  %v785_v57 = vmax.f32 %v746_v53, 0.0  ;;  %v873_v58 = vadd.f32 %v781_v51, %v780_v6  ;;  %v819_v59 = vadd.f32 %v779_v50, %v778_v45 }
 0x1fc   :  { %v749_v62 = vpop.f32.mrb[36].mxu1  ;;  %874 = vadd.xlane.f32.xlu0 %v873_v58  ;;  %v676_v63 = vpop.f32.mrb[36].mxu0  ;;  %v876_v0 = vadd.f32 %v785_v57, %v784_v55  ;;  %v822_v1 = vadd.f32 %v783_v56, %v782_v54 }
 0x1fd   :  { %v750_v2 = vadd.f32 %v749_v62, %v581_v60  ;;  %v677_v3 = vadd.f32 %v676_v63, %v581_v60  ;;  %v678_v4 = vpop.f32.mrb[37].mxu0  ;;  %v751_v5 = vpop.f32.mrb[37].mxu1 }
 0x1fe   :  { %v679_v7 = vadd.f32 %v678_v4, %v581_v60  ;;  %v752_v8 = vadd.f32 %v751_v5, %v581_v60  ;;  %v753_v9 = vpop.f32.mrb[38].mxu1  ;;  %877 = vadd.xlane.f32.xlu1 %v876_v0  ;;  %v680_v10 = vpop.f32.mrb[38].mxu0 }
 0x1ff   :  { %v788_v11 = vmax.f32 %v750_v2, 0.0  ;;  %v786_v12 = vmax.f32 %v677_v3, 0.0  ;;  %v754_v13 = vadd.f32 %v753_v9, %v586_v61  ;;  %v681_v14 = vadd.f32 %v680_v10, %v586_v61  ;;  %v682_v15 = vpop.f32.mrb[39].mxu0  ;;  %v755_v16 = vpop.f32.mrb[39].mxu1 }
 0x200   :  { %v787_v17 = vmax.f32 %v679_v7, 0.0  ;;  %v789_v18 = vmax.f32 %v752_v8, 0.0  ;;  %v683_v19 = vadd.f32 %v682_v15, %v586_v61  ;;  %v756_v20 = vadd.f32 %v755_v16, %v586_v61  ;;  %820 = vadd.xlane.f32.xlu0 %v819_v59  ;;  %v601_v56 = vpop.permute.xlu0 %600  ;;  %v606_v57 = vpop.permute.xlu1 %605 }
 0x201   :  { %v792_v21 = vmax.f32 %v754_v13, 0.0  ;;  %v790_v22 = vmax.f32 %v681_v14, 0.0 }
 0x202   :  { %v791_v23 = vmax.f32 %v683_v19, 0.0  ;;  %v793_v24 = vmax.f32 %v756_v20, 0.0  ;;  %v879_v25 = vadd.f32 %v789_v18, %v788_v11  ;;  %v825_v26 = vadd.f32 %v787_v17, %v786_v12 }
 0x204   :  { %v759_v29 = vpop.f32.mrb[40].mxu1  ;;  %880 = vadd.xlane.f32.xlu1 %v879_v25  ;;  %v686_v30 = vpop.f32.mrb[40].mxu0  ;;  %823 = vadd.xlane.f32.xlu0 %v822_v1  ;;  %v882_v31 = vadd.f32 %v793_v24, %v792_v21  ;;  %v828_v32 = vadd.f32 %v791_v23, %v790_v22 }
 0x205   :  { %v760_v33 = vadd.f32 %v759_v29, %v591_v27  ;;  %v687_v34 = vadd.f32 %v686_v30, %v591_v27  ;;  %v688_v35 = vpop.f32.mrb[41].mxu0  ;;  %v761_v36 = vpop.f32.mrb[41].mxu1 }
 0x206   :  { %v689_v37 = vadd.f32 %v688_v35, %v591_v27  ;;  %v762_v38 = vadd.f32 %v761_v36, %v591_v27  ;;  %v690_v39 = vpop.f32.mrb[42].mxu0  ;;  %v763_v40 = vpop.f32.mrb[42].mxu1  ;;  %v810_v36 = vld [vmem:[%s1267_s5] sm:$0xff] }
 0x207   :  { %v796_v41 = vmax.f32 %v760_v33, 0.0  ;;  %v794_v42 = vmax.f32 %v687_v34, 0.0  ;;  %v691_v43 = vadd.f32 %v690_v39, %v596_v28  ;;  %v764_v44 = vadd.f32 %v763_v40, %v596_v28  ;;  %v692_v45 = vpop.f32.mrb[43].mxu0  ;;  %v765_v6 = vpop.f32.mrb[43].mxu1  ;;  %v811_v33 = vld [vmem:[%s1267_s5 + $0x8] sm:$0xff] }
 0x208   :  { %v795_v46 = vmax.f32 %v689_v37, 0.0  ;;  %v797_v47 = vmax.f32 %v762_v38, 0.0  ;;  %v693_v48 = vadd.f32 %v692_v45, %v596_v28  ;;  %v766_v49 = vadd.f32 %v765_v6, %v596_v28  ;;  %883 = vadd.xlane.f32.xlu1 %v882_v31  ;;  %826 = vadd.xlane.f32.xlu0 %v825_v26  ;;  %v812_v37 = vld [vmem:[%s1267_s5 + $0x10] sm:$0xff] }
 0x209   :  { %v798_v50 = vmax.f32 %v691_v43, 0.0  ;;  %v800_v51 = vmax.f32 %v764_v44, 0.0  ;;  %v813_v44 = vld [vmem:[%s1267_s5 + $0x18] sm:$0xff] }
 0x20a   :  { %v799_v52 = vmax.f32 %v693_v48, 0.0  ;;  %v801_v53 = vmax.f32 %v766_v49, 0.0  ;;  %v885_v54 = vadd.f32 %v797_v47, %v796_v41  ;;  %v831_v55 = vadd.f32 %v795_v46, %v794_v42  ;;  %v814_v49 = vld [vmem:[%s1267_s5 + $0x20] sm:$0xff] }
 0x20c   :  { %v769_v58 = vpop.f32.mrb[44].mxu1  ;;  %886 = vadd.xlane.f32.xlu1 %v885_v54  ;;  %v696_v59 = vpop.f32.mrb[44].mxu0  ;;  %829 = vadd.xlane.f32.xlu0 %v828_v32  ;;  %v888_v60 = vadd.f32 %v801_v53, %v800_v51  ;;  %v834_v61 = vadd.f32 %v799_v52, %v798_v50 }
 0x20d   :  { %v770_v62 = vadd.f32 %v769_v58, %v601_v56  ;;  %v697_v63 = vadd.f32 %v696_v59, %v601_v56  ;;  %v698_v0 = vpop.f32.mrb[45].mxu0  ;;  %v771_v1 = vpop.f32.mrb[45].mxu1  ;;  %v815_v58 = vld [vmem:[%s1267_s5 + $0x28] sm:$0xff] }
 0x20e   :  { %v699_v2 = vadd.f32 %v698_v0, %v601_v56  ;;  %v772_v3 = vadd.f32 %v771_v1, %v601_v56  ;;  %v700_v4 = vpop.f32.mrb[46].mxu0  ;;  %v773_v5 = vpop.f32.mrb[46].mxu1  ;;  %v816_v0 = vld [vmem:[%s1267_s5 + $0x30] sm:$0xff] }
 0x20f   :  { %v804_v7 = vmax.f32 %v770_v62, 0.0  ;;  %v802_v8 = vmax.f32 %v697_v63, 0.0  ;;  %v701_v9 = vadd.f32 %v700_v4, %v606_v57  ;;  %v774_v10 = vadd.f32 %v773_v5, %v606_v57  ;;  %v702_v11 = vpop.f32.mrb[47].mxu0  ;;  %v775_v12 = vpop.f32.mrb[47].mxu1 }
 0x210   :  { %v803_v13 = vmax.f32 %v699_v2, 0.0  ;;  %v805_v14 = vmax.f32 %v772_v3, 0.0  ;;  %v703_v15 = vadd.f32 %v702_v11, %v606_v57  ;;  %v776_v16 = vadd.f32 %v775_v12, %v606_v57  ;;  %889 = vadd.xlane.f32.xlu1 %v888_v60  ;;  %832 = vadd.xlane.f32.xlu0 %v831_v55 }
 0x211   :  { %v806_v17 = vmax.f32 %v701_v9, 0.0  ;;  %v808_v18 = vmax.f32 %v774_v10, 0.0 }
 0x212   :  { %v807_v19 = vmax.f32 %v703_v15, 0.0  ;;  %v809_v20 = vmax.f32 %v776_v16, 0.0  ;;  %v891_v21 = vadd.f32 %v805_v14, %v804_v7  ;;  %v837_v22 = vadd.f32 %v803_v13, %v802_v8  ;;  %v817_v13 = vld [vmem:[%s1267_s5 + $0x38] sm:$0xff] }
 0x214   :  { %892 = vadd.xlane.f32.xlu1 %v891_v21  ;;  %835 = vadd.xlane.f32.xlu0 %v834_v61  ;;  %v894_v23 = vadd.f32 %v809_v20, %v808_v18  ;;  %v840_v24 = vadd.f32 %v807_v19, %v806_v17 }
 0x218   :  { %895 = vadd.xlane.f32.xlu1 %v894_v23  ;;  %838 = vadd.xlane.f32.xlu0 %v837_v22 }
 0x21c   :  { %841 = vadd.xlane.f32.xlu0 %v840_v24 }
 0x289   :  { %v875_v25 = vpop.xlane.xlu0 %874 }
 0x28a   :  { %v897_v34 = vmul.f32 0.00390625, %v875_v25 }
 0x28b   :  { %v878_v26 = vpop.xlane.xlu1 %877 }
 0x28c   :  { %v898_v32 = vmul.f32 0.00390625, %v878_v26  ;;  %v905_v6 = vmul.f32 %v897_v34, %v810_v36 }
 0x28d   :  { %v821_v27 = vpop.xlane.xlu0 %820 }
 0x28e   :  { %v906_v41 = vmul.f32 %v898_v32, %v811_v33  ;;  %v843_v43 = vmul.f32 0.00390625, %v821_v27 }
 0x290   :  { %v913_v53 = vadd.f32 %v906_v41, %v905_v6  ;;  %v851_v56 = vmul.f32 %v843_v43, %v810_v36 }
 0x291   :  { %v881_v28 = vpop.xlane.xlu1 %880  ;;  %v824_v29 = vpop.xlane.xlu0 %823 }
 0x292   :  { %v899_v35 = vmul.f32 0.00390625, %v881_v28  ;;  %v844_v38 = vmul.f32 0.00390625, %v824_v29 }
 0x294   :  { %v907_v46 = vmul.f32 %v899_v35, %v812_v37  ;;  %v852_v48 = vmul.f32 %v844_v38, %v811_v33 }
 0x295   :  { %v884_v30 = vpop.xlane.xlu1 %883  ;;  %v827_v31 = vpop.xlane.xlu0 %826 }
 0x296   :  { %v900_v42 = vmul.f32 0.00390625, %v884_v30  ;;  %v845_v45 = vmul.f32 0.00390625, %v827_v31  ;;  %v914_v59 = vadd.f32 %v913_v53, %v907_v46  ;;  %v859_v62 = vadd.f32 %v852_v48, %v851_v56 }
 0x298   :  { %v908_v54 = vmul.f32 %v900_v42, %v813_v44  ;;  %v853_v57 = vmul.f32 %v845_v45, %v812_v37 }
 0x299   :  { %v887_v39 = vpop.xlane.xlu1 %886  ;;  %v830_v40 = vpop.xlane.xlu0 %829 }
 0x29a   :  { %v901_v47 = vmul.f32 0.00390625, %v887_v39  ;;  %v846_v50 = vmul.f32 0.00390625, %v830_v40  ;;  %v915_v3 = vadd.f32 %v914_v59, %v908_v54  ;;  %v860_v8 = vadd.f32 %v859_v62, %v853_v57  ;;  %v818_v39 = vld [vmem:[%s1268_s6] sm:$0x1] }
 0x29c   :  { %v909_v60 = vmul.f32 %v901_v47, %v814_v49  ;;  %v854_v63 = vmul.f32 %v846_v50, %v813_v44 }
 0x29d   :  { %v890_v51 = vpop.xlane.xlu1 %889  ;;  %v833_v52 = vpop.xlane.xlu0 %832 }
 0x29e   :  { %v902_v55 = vmul.f32 0.00390625, %v890_v51  ;;  %v847_v61 = vmul.f32 0.00390625, %v833_v52  ;;  %v916_v9 = vadd.f32 %v915_v3, %v909_v60  ;;  %v861_v12 = vadd.f32 %v860_v8, %v854_v63 }
 0x2a0   :  { %v910_v4 = vmul.f32 %v902_v55, %v815_v58  ;;  %v855_v10 = vmul.f32 %v847_v61, %v814_v49 }
 0x2a1   :  { %v893_v1 = vpop.xlane.xlu1 %892  ;;  %v836_v2 = vpop.xlane.xlu0 %835 }
 0x2a2   :  { %v903_v5 = vmul.f32 0.00390625, %v893_v1  ;;  %v848_v7 = vmul.f32 0.00390625, %v836_v2  ;;  %v917_v16 = vadd.f32 %v916_v9, %v910_v4  ;;  %v862_v20 = vadd.f32 %v861_v12, %v855_v10 }
 0x2a4   :  { %v911_v11 = vmul.f32 %v903_v5, %v816_v0  ;;  %v856_v17 = vmul.f32 %v848_v7, %v815_v58 }
 0x2a5   :  { %v896_v14 = vpop.xlane.xlu1 %895  ;;  %v839_v15 = vpop.xlane.xlu0 %838 }
 0x2a6   :  { %v904_v18 = vmul.f32 0.00390625, %v896_v14  ;;  %v849_v19 = vmul.f32 0.00390625, %v839_v15  ;;  %v918_v21 = vadd.f32 %v917_v16, %v911_v11  ;;  %v863_v25 = vadd.f32 %v862_v20, %v856_v17 }
 0x2a8   :  { %v912_v22 = vmul.f32 %v904_v18, %v817_v13  ;;  %v857_v23 = vmul.f32 %v849_v19, %v816_v0 }
 0x2a9   :  { %v842_v24 = vpop.xlane.xlu0 %841 }
 0x2aa   :  { %v919_v26 = vadd.f32 %v918_v21, %v912_v22  ;;  %v850_v27 = vmul.f32 0.00390625, %v842_v24  ;;  %v864_v29 = vadd.f32 %v863_v25, %v857_v23 }
 0x2ac   :  { %v920_v28 = vrot.slane %v919_v26, 4  ;;  %v858_v30 = vmul.f32 %v850_v27, %v817_v13 }
 0x2ae   :  { %v921_v31 = vadd.f32 %v920_v28, %v919_v26  ;;  %v865_v32 = vadd.f32 %v864_v29, %v858_v30 }
 0x2b0   :  { %v922_v33 = vrot.slane %v921_v31, 2  ;;  %v866_v34 = vrot.slane %v865_v32, 4 }
 0x2b2   :  { %v923_v35 = vadd.f32 %v922_v33, %v921_v31  ;;  %v867_v36 = vadd.f32 %v866_v34, %v865_v32 }
 0x2b4   :  { %v924_v37 = vrot.slane %v923_v35, 1  ;;  %v868_v38 = vrot.slane %v867_v36, 2 }
 0x2b6   :  { %v869_v40 = vadd.f32 %v868_v38, %v867_v36  ;;  %v925_v41 = vadd.f32 %v924_v37, %v923_v35 }
 0x2b8   :  { %v870_v42 = vrot.slane %v869_v40, 1  ;;  %v926_v43 = vadd.f32 %v925_v41, %v818_v39 }
 0x2ba   :  { %v871_v44 = vadd.f32 %v870_v42, %v869_v40  ;;  %v928_v6 = vrot.slane %v926_v43, 7 }
 0x2bc   :  { %v872_v45 = vadd.f32 %v871_v44, %v818_v39 }
 0x2be   :  { %v931_v46 = vsel %vm930_vm2, %v872_v45, %v928_v6 }
 0x2bf   :  { %932 = vst [vmem:[#allocation2] sm:$0x3] %v931_v46 }
 0x2c0   :  { %1012 = shalt.err (!%p1009_p4)
}
 0x2c1   :  { %s1013_s4 = scalar_lea.hbm %s1269_s7, 32 }
 0x2c2   :  { %p1014_p5 = scmp.ne.s32.totalorder %s1269_s7, %s1013_s4  ;;  %p1017_p6 = scmp.lt.u32.totalorder %s1013_s4, %s1269_s7 }
 0x2c4   :  { %p1019_p7 = pnand %p1017_p6, %p1014_p5 }
 0x2c6   :  { %1022 = shalt.err (!%p1019_p7)
}
 0x2c7   :  { %942 = dma.vmem_to_hbm [thread:$0]  %s940_s17, 32, %s1269_s7, [#allocation3]  }
 0x2c8   :  { %1023 = dma.done.wait [#allocation3], 32  }
 0x2c9   :  { %1024 = vsyncadd [#allocation3], 4294967264 }
 0x2ca   :  { %946 = vsyncpa [#allocation3], 1 }

</bundles_post_ra>
